<compile_context>
chip_gen: v7x
topology: tpu7x:2x2x1
jax: 0.10.0
libtpu: 0.0.40
codegen_flags: <defaults>
</compile_context>

<pallas_src>
import math

import jax
import jax.numpy as jnp
from jax.experimental import pallas as pl
from jax.experimental.pallas import tpu as pltpu

IN_DIM = 784
HID_DIM = 100
OUT_DIM = 10
HID_PAD = 128   # hidden dim padded to lane width (padding is exact zeros)
OUT_PAD = 128   # layer-3 matmul N padded to lane width; only first 10 cols stored


def mlp_kernel(x_ref, w1_ref, b1_ref, w2_ref, b2_ref, w3_ref, b3_ref, o_ref):
    # Layer 1: Linear(784 -> 128pad) + ReLU.  bf16 inputs, f32 accumulate.
    h = jnp.dot(x_ref[...], w1_ref[...], preferred_element_type=jnp.float32)
    h = jnp.maximum(h + b1_ref[...], 0.0)
    # Layer 2: Linear(128pad -> 128pad) + ReLU (padded K rows/cols are exact zeros).
    h = jnp.dot(h.astype(jnp.bfloat16), w2_ref[...],
                preferred_element_type=jnp.float32)
    h = jnp.maximum(h + b2_ref[...], 0.0)
    # Layer 3: Linear(128pad -> 128pad), no activation; store only the 10 real lanes.
    out = jnp.dot(h.astype(jnp.bfloat16), w3_ref[...],
                  preferred_element_type=jnp.float32)
    o_ref[...] = (out + b3_ref[...])[:, :OUT_DIM].astype(o_ref.dtype)


def _round_up(v, m):
    return ((v + m - 1) // m) * m


def _choose_tb(B, tb):
    """Batch tile: full batch if tiny, else >= ~4 grid steps, sublane-aligned."""
    if B <= 8:
        return B                         # block == full batch dim (always legal)
    quarter = _round_up(pl.cdiv(B, 4), 8)
    return max(8, min(tb, quarter))


def simple_net_fc_100(x, padded_params, *, tb=2048):
    """x: (B, 784), padded_params: lane-padded bf16 weights + f32 biases -> (B, 10) f32."""
    w1, b1, w2, b2, w3, b3 = padded_params
    B = x.shape[0]
    x = x.astype(jnp.bfloat16)           # halve the dominant HBM read
    TB = _choose_tb(B, tb)
    grid = (pl.cdiv(B, TB),)

    _has_buffered = hasattr(pl, "Buffered")

    def resident(shape):
        # Full-array block, same block index every step -> stays in VMEM.
        # Single-buffered: its block never changes, so double-buffering is waste.
        if _has_buffered:
            return pl.BlockSpec(shape, lambda i: (0, 0),
                                pipeline_mode=pl.Buffered(1))
        return pl.BlockSpec(shape, lambda i: (0, 0))

    flops = 2 * B * (IN_DIM * HID_PAD + HID_PAD * HID_PAD + HID_PAD * OUT_PAD)
    bytes_accessed = (
        2 * B * IN_DIM                                            # x (bf16)
        + 4 * B * OUT_DIM                                         # out (f32)
        + 2 * (IN_DIM * HID_PAD + HID_PAD * HID_PAD + HID_PAD * OUT_PAD)  # weights bf16
        + 4 * (HID_PAD + HID_PAD + OUT_PAD)                       # biases f32
    )

    out = pl.pallas_call(
        mlp_kernel,
        out_shape=jax.ShapeDtypeStruct((B, OUT_DIM), jnp.float32),
        grid=grid,
        in_specs=[
            pl.BlockSpec((TB, IN_DIM), lambda i: (i, 0)),   # x: batch-tiled, double-buffered
            resident((IN_DIM, HID_PAD)),                    # w1 (bf16)
            resident((1, HID_PAD)),                         # b1 (f32)
            resident((HID_PAD, HID_PAD)),                   # w2 (bf16)
            resident((1, HID_PAD)),                         # b2 (f32)
            resident((HID_PAD, OUT_PAD)),                   # w3 (bf16)
            resident((1, OUT_PAD)),                         # b3 (f32)
        ],
        out_specs=pl.BlockSpec((TB, OUT_DIM), lambda i: (i, 0)),
        compiler_params=pltpu.CompilerParams(
            dimension_semantics=("parallel",),              # batch axis over v7x's 2 TCs
            vmem_limit_bytes=48 * 1024 * 1024,              # ample headroom on 64 MiB v7x
        ),
        cost_estimate=pl.CostEstimate(
            flops=flops, transcendentals=0, bytes_accessed=bytes_accessed
        ),
    )(x, w1, b1, w2, b2, w3, b3)
    return out


def xavier_uniform(key, fan_in, fan_out):
    # Matches the module's Xavier(): a = sqrt(3) * sqrt(2 / (fan_in + fan_out))
    std = 1.0 * math.sqrt(2.0 / (fan_in + fan_out))
    a = math.sqrt(3.0) * std
    # Stored as (in, out); PyTorch stores (out, in) and does x @ W.T — same math.
    return jax.random.uniform(key, (fan_in, fan_out), jnp.float32, minval=-a, maxval=a)


def init_params(key):
    """Logical (unpadded, f32) params: (784,100),(1,100),(100,100),(1,100),(100,10),(1,10)."""
    sizes = [IN_DIM, HID_DIM, HID_DIM, OUT_DIM]
    keys = jax.random.split(key, len(sizes) - 1)
    params = []
    for i in range(len(sizes) - 1):
        w = xavier_uniform(keys[i], sizes[i], sizes[i + 1])
        b = jnp.zeros((1, sizes[i + 1]), jnp.float32)  # bias filled with 0.0
        params.extend([w, b])
    return tuple(params)


def pad_params(params):
    """Zero-pad feature dims to 128 lanes; weights -> bf16 (MXU inputs), biases stay f32."""
    w1, b1, w2, b2, w3, b3 = params
    w1p = jnp.pad(w1, ((0, 0), (0, HID_PAD - HID_DIM))).astype(jnp.bfloat16)
    b1p = jnp.pad(b1, ((0, 0), (0, HID_PAD - HID_DIM)))
    w2p = jnp.pad(w2, ((0, HID_PAD - HID_DIM), (0, HID_PAD - HID_DIM))).astype(jnp.bfloat16)
    b2p = jnp.pad(b2, ((0, 0), (0, HID_PAD - HID_DIM)))
    w3p = jnp.pad(w3, ((0, HID_PAD - HID_DIM), (0, OUT_PAD - OUT_DIM))).astype(jnp.bfloat16)
    b3p = jnp.pad(b3, ((0, 0), (0, OUT_PAD - OUT_DIM)))
    return (w1p, b1p, w2p, b2p, w3p, b3p)


def reference_forward_f32(x, params):
    w1, b1, w2, b2, w3, b3 = params
    h = jnp.maximum(x @ w1 + b1, 0.0)
    h = jnp.maximum(h @ w2 + b2, 0.0)
    return h @ w3 + b3


def reference_forward_mixed(x, params):
    """Same mixed precision as the kernel: bf16 matmul inputs, f32 accumulation."""
    w1, b1, w2, b2, w3, b3 = params
    h = jnp.dot(x.astype(jnp.bfloat16), w1.astype(jnp.bfloat16),
                preferred_element_type=jnp.float32)
    h = jnp.maximum(h + b1, 0.0)
    h = jnp.dot(h.astype(jnp.bfloat16), w2.astype(jnp.bfloat16),
                preferred_element_type=jnp.float32)
    h = jnp.maximum(h + b2, 0.0)
    out = jnp.dot(h.astype(jnp.bfloat16), w3.astype(jnp.bfloat16),
                  preferred_element_type=jnp.float32)
    return out + b3


if __name__ == "__main__":
    key = jax.random.PRNGKey(0)
    k_params, k_x1, k_x2 = jax.random.split(key, 3)
    params = init_params(k_params)
    padded_params = pad_params(params)

    # Case 1: tiny batch (block == full batch dim).
    x_small = jax.random.normal(k_x1, (4, IN_DIM), jnp.float32)
    out_small = jax.block_until_ready(simple_net_fc_100(x_small, padded_params))
    assert out_small.shape == (4, OUT_DIM)
    ref_mixed = reference_forward_mixed(x_small, params)
    ref_f32 = reference_forward_f32(x_small, params)
    assert jnp.allclose(out_small, ref_mixed, atol=2e-3, rtol=2e-3), "mismatch vs bf16 reference"
    assert jnp.allclose(out_small, ref_f32, atol=5e-2, rtol=5e-2), "mismatch vs f32 reference"

    # Case 2: multi-step grid with a partial edge tile (B=20, TB=8 -> grid=3).
    x_med = jax.random.normal(k_x2, (20, IN_DIM), jnp.float32)
    out_med = jax.block_until_ready(simple_net_fc_100(x_med, padded_params))
    assert out_med.shape == (20, OUT_DIM)
    ref_mixed_m = reference_forward_mixed(x_med, params)
    ref_f32_m = reference_forward_f32(x_med, params)
    assert jnp.allclose(out_med, ref_mixed_m, atol=2e-3, rtol=2e-3), "mismatch vs bf16 reference (tiled)"
    assert jnp.allclose(out_med, ref_f32_m, atol=5e-2, rtol=5e-2), "mismatch vs f32 reference (tiled)"

    print("KERNEL_OK")
</pallas_src>

<mosaic_0001>
module attributes {stable_mosaic.version = 11 : i64} {
  func.func @mlp_kernel(%arg0: i32, %arg1: memref<4x784xbf16, #tpu.memory_space<vmem>>, %arg2: memref<784x128xbf16, #tpu.memory_space<vmem>>, %arg3: memref<1x128xf32, #tpu.memory_space<vmem>>, %arg4: memref<128x128xbf16, #tpu.memory_space<vmem>>, %arg5: memref<1x128xf32, #tpu.memory_space<vmem>>, %arg6: memref<128x128xbf16, #tpu.memory_space<vmem>>, %arg7: memref<1x128xf32, #tpu.memory_space<vmem>>, %arg8: memref<4x10xf32, #tpu.memory_space<vmem>>) attributes {dimension_semantics = [#tpu.dimension_semantics<parallel>], iteration_bounds = array<i64: 1>, scalar_prefetch = 0 : i64, scratch_operands = 0 : i64, tpu.core_type = #tpu.core_type<tc>, window_params = [{transform_indices = @transform_0, window_bounds = array<i64: 4, 784>}, {pipeline_mode = #tpu.pipeline_mode<synchronous>, transform_indices = @transform_1, window_bounds = array<i64: 784, 128>}, {pipeline_mode = #tpu.pipeline_mode<synchronous>, transform_indices = @transform_2, window_bounds = array<i64: 1, 128>}, {pipeline_mode = #tpu.pipeline_mode<synchronous>, transform_indices = @transform_3, window_bounds = array<i64: 128, 128>}, {pipeline_mode = #tpu.pipeline_mode<synchronous>, transform_indices = @transform_4, window_bounds = array<i64: 1, 128>}, {pipeline_mode = #tpu.pipeline_mode<synchronous>, transform_indices = @transform_5, window_bounds = array<i64: 128, 128>}, {pipeline_mode = #tpu.pipeline_mode<synchronous>, transform_indices = @transform_6, window_bounds = array<i64: 1, 128>}, {transform_indices = @transform_7, window_bounds = array<i64: 4, 10>}]} {
    %c0 = arith.constant 0 : index
    %c0_0 = arith.constant 0 : index
    %0 = vector.load %arg1[%c0, %c0_0] : memref<4x784xbf16, #tpu.memory_space<vmem>>, vector<4x784xbf16>
    %c0_1 = arith.constant 0 : index
    %c0_2 = arith.constant 0 : index
    %1 = vector.load %arg2[%c0_1, %c0_2] : memref<784x128xbf16, #tpu.memory_space<vmem>>, vector<784x128xbf16>
    %cst = arith.constant dense<0.000000e+00> : vector<4x128xf32>
    %2 = tpu.matmul %0, %1, %cst {dimension_numbers = #tpu.dot_dimension_numbers<[1], [0], [0], [1], [0, 0, 1, 1], [], []>} : vector<4x784xbf16>, vector<784x128xbf16>, vector<4x128xf32> -> vector<4x128xf32>
    %c0_3 = arith.constant 0 : index
    %c0_4 = arith.constant 0 : index
    %3 = vector.load %arg3[%c0_3, %c0_4] : memref<1x128xf32, #tpu.memory_space<vmem>>, vector<1x128xf32>
    %4 = vector.broadcast %3 : vector<1x128xf32> to vector<4x128xf32>
    %5 = arith.addf %2, %4 : vector<4x128xf32>
    %cst_5 = arith.constant 0.000000e+00 : f32
    %6 = vector.broadcast %cst_5 : f32 to vector<4x128xf32>
    %7 = arith.maximumf %5, %6 : vector<4x128xf32>
    %8 = arith.truncf %7 : vector<4x128xf32> to vector<4x128xbf16>
    %c0_6 = arith.constant 0 : index
    %c0_7 = arith.constant 0 : index
    %9 = vector.load %arg4[%c0_6, %c0_7] : memref<128x128xbf16, #tpu.memory_space<vmem>>, vector<128x128xbf16>
    %cst_8 = arith.constant dense<0.000000e+00> : vector<4x128xf32>
    %10 = tpu.matmul %8, %9, %cst_8 {dimension_numbers = #tpu.dot_dimension_numbers<[1], [0], [0], [1], [0, 0, 1, 1], [], []>} : vector<4x128xbf16>, vector<128x128xbf16>, vector<4x128xf32> -> vector<4x128xf32>
    %c0_9 = arith.constant 0 : index
    %c0_10 = arith.constant 0 : index
    %11 = vector.load %arg5[%c0_9, %c0_10] : memref<1x128xf32, #tpu.memory_space<vmem>>, vector<1x128xf32>
    %12 = vector.broadcast %11 : vector<1x128xf32> to vector<4x128xf32>
    %13 = arith.addf %10, %12 : vector<4x128xf32>
    %cst_11 = arith.constant 0.000000e+00 : f32
    %14 = vector.broadcast %cst_11 : f32 to vector<4x128xf32>
    %15 = arith.maximumf %13, %14 : vector<4x128xf32>
    %16 = arith.truncf %15 : vector<4x128xf32> to vector<4x128xbf16>
    %c0_12 = arith.constant 0 : index
    %c0_13 = arith.constant 0 : index
    %17 = vector.load %arg6[%c0_12, %c0_13] : memref<128x128xbf16, #tpu.memory_space<vmem>>, vector<128x128xbf16>
    %cst_14 = arith.constant dense<0.000000e+00> : vector<4x128xf32>
    %18 = tpu.matmul %16, %17, %cst_14 {dimension_numbers = #tpu.dot_dimension_numbers<[1], [0], [0], [1], [0, 0, 1, 1], [], []>} : vector<4x128xbf16>, vector<128x128xbf16>, vector<4x128xf32> -> vector<4x128xf32>
    %c0_15 = arith.constant 0 : index
    %c0_16 = arith.constant 0 : index
    %19 = vector.load %arg7[%c0_15, %c0_16] : memref<1x128xf32, #tpu.memory_space<vmem>>, vector<1x128xf32>
    %20 = vector.broadcast %19 : vector<1x128xf32> to vector<4x128xf32>
    %21 = arith.addf %18, %20 : vector<4x128xf32>
    %22 = vector.extract_strided_slice %21 {offsets = [0, 0], sizes = [4, 10], strides = [1, 1]} : vector<4x128xf32> to vector<4x10xf32>
    %c0_17 = arith.constant 0 : index
    %c0_18 = arith.constant 0 : index
    %23 = vector.load %arg8[%c0_17, %c0_18] : memref<4x10xf32, #tpu.memory_space<vmem>>, vector<4x10xf32>
    tpu.vector_store %arg8[%c0_17, %c0_18], %22 {strides = array<i32>} : memref<4x10xf32, #tpu.memory_space<vmem>>, vector<4x10xf32>,
    return
  }
  func.func @transform_0(%arg0: i32) -> (i32, i32) {
    %c0_i32 = arith.constant 0 : i32
    %c0_i32_0 = arith.constant 0 : i32
    return %arg0, %c0_i32 : i32, i32
  }
  func.func @transform_1(%arg0: i32) -> (i32, i32) {
    %c0_i32 = arith.constant 0 : i32
    %c0_i32_0 = arith.constant 0 : i32
    %c0_i32_1 = arith.constant 0 : i32
    return %c0_i32, %c0_i32_0 : i32, i32
  }
  func.func @transform_2(%arg0: i32) -> (i32, i32) {
    %c0_i32 = arith.constant 0 : i32
    %c0_i32_0 = arith.constant 0 : i32
    %c0_i32_1 = arith.constant 0 : i32
    return %c0_i32, %c0_i32_0 : i32, i32
  }
  func.func @transform_3(%arg0: i32) -> (i32, i32) {
    %c0_i32 = arith.constant 0 : i32
    %c0_i32_0 = arith.constant 0 : i32
    %c0_i32_1 = arith.constant 0 : i32
    return %c0_i32, %c0_i32_0 : i32, i32
  }
  func.func @transform_4(%arg0: i32) -> (i32, i32) {
    %c0_i32 = arith.constant 0 : i32
    %c0_i32_0 = arith.constant 0 : i32
    %c0_i32_1 = arith.constant 0 : i32
    return %c0_i32, %c0_i32_0 : i32, i32
  }
  func.func @transform_5(%arg0: i32) -> (i32, i32) {
    %c0_i32 = arith.constant 0 : i32
    %c0_i32_0 = arith.constant 0 : i32
    %c0_i32_1 = arith.constant 0 : i32
    return %c0_i32, %c0_i32_0 : i32, i32
  }
  func.func @transform_6(%arg0: i32) -> (i32, i32) {
    %c0_i32 = arith.constant 0 : i32
    %c0_i32_0 = arith.constant 0 : i32
    %c0_i32_1 = arith.constant 0 : i32
    return %c0_i32, %c0_i32_0 : i32, i32
  }
  func.func @transform_7(%arg0: i32) -> (i32, i32) {
    %c0_i32 = arith.constant 0 : i32
    %c0_i32_0 = arith.constant 0 : i32
    return %arg0, %c0_i32 : i32, i32
  }
}

</mosaic_0001>

<bundles_post_ra>
// kernel: tpu_custom_call.1
= control target key start
LH: loop header
LB: loop body
LE: loop exit
PB: predicated region body
PF: predicated region fallthrough
CT: control target
= control target key end

     0   :  { %12 = vsyncpa [#allocation3], 0  ;;  %s1479_s0 = inlined_call_operand.hbm [shape: bf16[4,784], index: 0, kind: input, shape index: {}]   ;;  %s1480_s1 = inlined_call_operand.hbm [shape: bf16[784,128], index: 1, kind: input, shape index: {}]   ;;  %s1481_s2 = inlined_call_operand.vmem [shape: f32[1,128], index: 2, kind: input, shape index: {}]   ;;  %s1482_s3 = inlined_call_operand.hbm [shape: bf16[128,128], index: 3, kind: input, shape index: {}]   ;;  %s1483_s4 = inlined_call_operand.vmem [shape: f32[1,128], index: 4, kind: input, shape index: {}]   ;;  %s1484_s5 = inlined_call_operand.hbm [shape: bf16[128,128], index: 5, kind: input, shape index: {}]   ;;  %s1485_s6 = inlined_call_operand.vmem [shape: f32[1,128], index: 6, kind: input, shape index: {}]   ;;  %s1486_s7 = inlined_call_operand.hbm [shape: f32[4,10], index: 7, kind: output, shape index: {}]  }
   0x1   :  { %13 = vsyncpa [#allocation6], 0 }
   0x2   :  { %14 = vsyncpa [#allocation9], 0 }
   0x3   :  { %15 = vsyncpa [#allocation4], 0  ;;  %s1328_s24 = smov [#allocation5]   ;;  %s1210_s28 = scalar_lea.hbm %s1480_s1, 6272 }
   0x4   :  { %s31_s25 = sshll.u32 %s1328_s24, 4  ;;  %p1211_p0 = scmp.ne.s32.totalorder %s1480_s1, %s1210_s28  ;;  %s32_s25 = int_to_ptr.vmem [resolvable:$true] %s31_s25 }
   0x5   :  { %p1214_p1 = scmp.lt.u32.totalorder %s1210_s28, %s1480_s1 }
   0x7   :  { %p1216_p2 = pnand %p1214_p1, %p1211_p0 }
   0x9   :  { %1219 = shalt.err (!%p1216_p2)
}
   0xa   :  { %s1220_s10 = scalar_lea.vmem %s32_s25, 6272  ;;  %p1225_p4 = scmp.lt.s32.totalorder %s32_s25, %s32_s25 }
   0xb   :  { %p1221_p3 = scmp.ne.s32.totalorder %s32_s25, %s1220_s10  ;;  %p1226_p5 = scmp.lt.s32.totalorder %s1220_s10, %s1220_s10 }
   0xd   :  { %p1227_p6 = por %p1226_p5, %p1225_p4 }
   0xf   :  { %p1228_p7 = pnand %p1227_p6, %p1221_p3 }
  0x11   :  { %1231 = shalt.err (!%p1228_p7)
}
  0x12   :  { %s1329_s11 = smov 64   ;;  %s1330_s12 = smov 4  }
  0x13   :  { %37 = dma.hbm_to_vmem [thread:$0]  %s1480_s1, 6272, %s32_s25, [#allocation6], %s1329_s11, %s1329_s11, %s1330_s12  }
  0x14   :  { %s1331_s15 = smov [#allocation2]   ;;  %s1332_s17 = smov [#allocation7]  }
  0x15   :  { %s22_s16 = sshll.u32 %s1331_s15, 4  ;;  %s45_s18 = sshll.u32 %s1332_s17, 4  ;;  %s23_s16 = int_to_ptr.vmem [resolvable:$true] %s22_s16  ;;  %s46_s18 = int_to_ptr.vmem [resolvable:$true] %s45_s18 }
  0x16   :  { %s1232_s21 = scalar_lea.hbm %s1479_s0, 224 }
  0x17   :  { %p1233_p8 = scmp.ne.s32.totalorder %s1479_s0, %s1232_s21  ;;  %p1236_p9 = scmp.lt.u32.totalorder %s1232_s21, %s1479_s0 }
  0x19   :  { %p1238_p10 = pnand %p1236_p9, %p1233_p8 }
  0x1b   :  { %1241 = shalt.err (!%p1238_p10)
}
  0x1c   :  { %s1242_s1 = scalar_lea.vmem %s23_s16, 224  ;;  %p1247_p12 = scmp.lt.s32.totalorder %s23_s16, %s23_s16 }
  0x1d   :  { %p1243_p11 = scmp.ne.s32.totalorder %s23_s16, %s1242_s1  ;;  %p1248_p13 = scmp.lt.s32.totalorder %s1242_s1, %s1242_s1 }
  0x1f   :  { %p1249_p0 = por %p1248_p13, %p1247_p12 }
  0x21   :  { %p1250_p1 = pnand %p1249_p0, %p1243_p11 }
  0x23   :  { %1253 = shalt.err (!%p1250_p1)
}
  0x24   :  { %25 = dma.hbm_to_vmem [thread:$0]  %s1479_s0, 224, %s23_s16, [#allocation3]  }
  0x25   :  { %s1254_s30 = scalar_lea.hbm %s1482_s3, 1024 }
  0x26   :  { %p1255_p2 = scmp.ne.s32.totalorder %s1482_s3, %s1254_s30  ;;  %p1258_p3 = scmp.lt.u32.totalorder %s1254_s30, %s1482_s3 }
  0x28   :  { %p1260_p4 = pnand %p1258_p3, %p1255_p2 }
  0x2a   :  { %1263 = shalt.err (!%p1260_p4)
}
  0x2b   :  { %s1264_s14 = scalar_lea.vmem %s46_s18, 1024  ;;  %p1269_p6 = scmp.lt.s32.totalorder %s46_s18, %s46_s18 }
  0x2c   :  { %p1265_p5 = scmp.ne.s32.totalorder %s46_s18, %s1264_s14  ;;  %p1270_p7 = scmp.lt.s32.totalorder %s1264_s14, %s1264_s14 }
  0x2e   :  { %p1271_p8 = por %p1270_p7, %p1269_p6 }
  0x30   :  { %p1272_p9 = pnand %p1271_p8, %p1265_p5 }
  0x32   :  { %1275 = shalt.err (!%p1272_p9)
}
  0x33   :  { %51 = dma.hbm_to_vmem [thread:$0]  %s1482_s3, 1024, %s46_s18, [#allocation6], %s1329_s11, %s1329_s11, %s1330_s12  }
  0x34   :  { %s1333_s16 = smov [#allocation8]   ;;  %s1276_s21 = scalar_lea.hbm %s1484_s5, 1024 }
  0x35   :  { %s59_s17 = sshll.u32 %s1333_s16, 4  ;;  %p1277_p10 = scmp.ne.s32.totalorder %s1484_s5, %s1276_s21  ;;  %s60_s17 = int_to_ptr.vmem [resolvable:$true] %s59_s17 }
  0x36   :  { %p1280_p11 = scmp.lt.u32.totalorder %s1276_s21, %s1484_s5 }
  0x38   :  { %p1282_p12 = pnand %p1280_p11, %p1277_p10 }
  0x3a   :  { %1285 = shalt.err (!%p1282_p12)
}
  0x3b   :  { %s1286_s1 = scalar_lea.vmem %s60_s17, 1024  ;;  %p1291_p0 = scmp.lt.s32.totalorder %s60_s17, %s60_s17 }
  0x3c   :  { %p1287_p13 = scmp.ne.s32.totalorder %s60_s17, %s1286_s1  ;;  %p1292_p1 = scmp.lt.s32.totalorder %s1286_s1, %s1286_s1 }
  0x3e   :  { %p1293_p2 = por %p1292_p1, %p1291_p0 }
  0x40   :  { %p1294_p3 = pnand %p1293_p2, %p1287_p13 }
  0x42   :  { %1297 = shalt.err (!%p1294_p3)
}
  0x43   :  { %65 = dma.hbm_to_vmem [thread:$0]  %s1484_s5, 1024, %s60_s17, [#allocation9], %s1329_s11, %s1329_s11, %s1330_s12  }
  0x44   :  { %1320 = dma.done.wait [#allocation3], 224  }
  0x45   :  { %1321 = vsyncadd [#allocation3], 4294967072 }
  0x46   :  { %1322 = dma.done.wait [#allocation6], 7296  }
  0x47   :  { %1323 = vsyncadd [#allocation6], 4294960000 }
  0x48   :  { %1324 = dma.done.wait [#allocation9], 1024  }
  0x49   :  { %1325 = vsyncadd [#allocation9], 4294966272  ;;  %v1143_v0 = vld [vmem:[#allocation5 + $0x40] sm:$0xff]   ;;  %v1147_v4 = vld [vmem:[#allocation5 + $0x48] sm:$0xff]   ;;  %v1334_v21 = vmov 1983009808   ;;  %v194_v23 = vlaneseq }
  0x4a   :  { %v1144_v1 = vld [vmem:[#allocation5] sm:$0xff]   ;;  %1001 = vmatprep.subr.bf16.mxu0 %v1143_v0  ;;  %v1148_v5 = vld [vmem:[#allocation5 + $0x8] sm:$0xff]   ;;  %v1151_v8 = vld [vmem:[#allocation5 + $0x50] sm:$0xff]   ;;  %v192_v22 = vunpack.c.l.s4 %v1334_v21  ;;  %v1335_v46 = vmov 0.0   ;;  %vm1336_vm0 = vmmov 0   ;;  %vm523_vm1 = vcmask 130048  }
  0x4b   :  { %v1145_v2 = vld [vmem:[#allocation5 + $0xc0] sm:$0xff]   ;;  %1002 = vmatpush3.bf16.msra.mxu0 %v1144_v1  ;;  %v1149_v6 = vld [vmem:[#allocation5 + $0xc8] sm:$0xff]   ;;  %v1152_v9 = vld [vmem:[#allocation5 + $0x10] sm:$0xff]   ;;  %v195_v29 = vshrl.u32 %v194_v23, 7  ;;  %s1337_s28 = smov [#allocation10]   ;;  %vm913_vm2 = vcmask 76800  }
  0x4c   :  { %v1146_v3 = vld [vmem:[#allocation5 + $0x80] sm:$0xff]   ;;  %1023 = vmatprep.subr.bf16.mxu1 %v1145_v2  ;;  %1003 = vmatprep.subr.bf16.mxu0 %v1147_v4  ;;  %v1150_v7 = vld [vmem:[#allocation5 + $0x88] sm:$0xff]   ;;  %v1153_v10 = vld [vmem:[#allocation5 + $0xd0] sm:$0xff]   ;;  %v193_v28 = vunpack.c.0.s8 %v192_v22  ;;  %s921_s29 = sshll.u32 %s1337_s28, 4  ;;  %s922_s29 = int_to_ptr.vmem [resolvable:$true] %s921_s29 }
  0x4d   :  { %1024 = vmatpush3.bf16.msra.mxu1 %v1146_v3  ;;  %v1154_v11 = vld [vmem:[#allocation5 + $0x90] sm:$0xff]   ;;  %v1155_v12 = vld [vmem:[#allocation5 + $0x58] sm:$0xff]   ;;  %v1159_v16 = vld [vmem:[#allocation5 + $0x60] sm:$0xff]   ;;  %p1303_p5 = scmp.lt.s32.totalorder %s922_s29, %s922_s29 }
  0x4e   :  { %1025 = vmatprep.subr.bf16.mxu1 %v1149_v6  ;;  %v1156_v13 = vld [vmem:[#allocation5 + $0x18] sm:$0xff]   ;;  %v1160_v17 = vld [vmem:[#allocation5 + $0x20] sm:$0xff]   ;;  %v1163_v20 = vld [vmem:[#allocation5 + $0x68] sm:$0xff]   ;;  %v196_v34 = vsub.s32 %v193_v28, %v195_v29 }
  0x4f   :  { %1004 = vmatpush3.bf16.msra.mxu0 %v1148_v5  ;;  %v1157_v14 = vld [vmem:[#allocation5 + $0xd8] sm:$0xff]   ;;  %v1161_v18 = vld [vmem:[#allocation5 + $0xe0] sm:$0xff]   ;;  %v1164_v24 = vld [vmem:[#allocation5 + $0x28] sm:$0xff]  }
  0x50   :  { %1005 = vmatprep.subr.bf16.mxu0 %v1151_v8  ;;  %v1158_v15 = vld [vmem:[#allocation5 + $0x98] sm:$0xff]   ;;  %v1162_v19 = vld [vmem:[#allocation5 + $0xa0] sm:$0xff]   ;;  %v1165_v25 = vld [vmem:[#allocation5 + $0xe8] sm:$0xff]  }
  0x51   :  { %1026 = vmatpush3.bf16.msra.mxu1 %v1150_v7  ;;  %v1166_v26 = vld [vmem:[#allocation5 + $0xa8] sm:$0xff]   ;;  %v1167_v27 = vld [vmem:[#allocation5 + $0x70] sm:$0xff]   ;;  %v1171_v33 = vld [vmem:[#allocation5 + $0x78] sm:$0xff]  }
  0x52   :  { %1027 = vmatprep.subr.bf16.mxu1 %v1153_v10  ;;  %v1168_v30 = vld [vmem:[#allocation5 + $0x30] sm:$0xff]   ;;  %v1172_v35 = vld [vmem:[#allocation5 + $0x38] sm:$0xff]   ;;  %v1175_v41 = vld [vmem:[#allocation5 + $0x140] sm:$0xff]  }
  0x53   :  { %1006 = vmatpush3.bf16.msra.mxu0 %v1152_v9  ;;  %v1169_v31 = vld [vmem:[#allocation5 + $0xf0] sm:$0xff]   ;;  %v1173_v36 = vld [vmem:[#allocation5 + $0xf8] sm:$0xff]   ;;  %v1177_v44 = vld [vmem:[#allocation5 + $0x100] sm:$0xff]  }
  0x54   :  { %1007 = vmatprep.subr.bf16.mxu0 %v1155_v12  ;;  %v1170_v32 = vld [vmem:[#allocation5 + $0xb0] sm:$0xff]   ;;  %v1174_v39 = vld [vmem:[#allocation5 + $0xb8] sm:$0xff]   ;;  %v1178_v45 = vld [vmem:[#allocation5 + $0x148] sm:$0xff]  }
  0x55   :  { %1028 = vmatpush3.bf16.msra.mxu1 %v1154_v11  ;;  %v81_v37 = vld [vmem:[#allocation2] sm:$0xff]  ;;  %v1179_v48 = vld [vmem:[#allocation5 + $0x108] sm:$0xff]   ;;  %v1184_v53 = vld [vmem:[#allocation5 + $0x160] sm:$0xff]  }
  0x56   :  { %1029 = vmatprep.subr.bf16.mxu1 %v1157_v14  ;;  %v197_v38 = vrot.slane %v81_v37, %v196_v34  ;;  %v190_v40 = vcombine.high %v81_v37, %v81_v37  ;;  %v1180_v49 = vld [vmem:[#allocation5 + $0x150] sm:$0xff]   ;;  %v1182_v51 = vld [vmem:[#allocation5 + $0x158] sm:$0xff]   ;;  %v1185_v54 = vld [vmem:[#allocation5 + $0x120] sm:$0xff]  }
  0x57   :  { %1008 = vmatpush3.bf16.msra.mxu0 %v1156_v13  ;;  %v1181_v50 = vld [vmem:[#allocation5 + $0x110] sm:$0xff]   ;;  %v1183_v52 = vld [vmem:[#allocation5 + $0x118] sm:$0xff]   ;;  %v1186_v55 = vld [vmem:[#allocation5 + $0x168] sm:$0xff]  }
  0x58   :  { %1009 = vmatprep.subr.bf16.mxu0 %v1159_v16  ;;  %v205_v42 = vcombine.high %v197_v38, %v197_v38  ;;  %v204_v43 = vrot.slane %v190_v40, %v196_v34  ;;  %v1192_v56 = vld [vmem:[#allocation5 + $0x180] sm:$0xff]   ;;  %v82_v57 = vld [vmem:[#allocation2 + $0x8] sm:$0x3f]  ;;  %v1187_v60 = vld [vmem:[#allocation5 + $0x128] sm:$0xff]  }
  0x59   :  { %1030 = vmatpush3.bf16.msra.mxu1 %v1158_v15  ;;  %v207_v58 = vcombine.high %v82_v57, %v82_v57  ;;  %v214_v59 = vrot.slane %v82_v57, %v196_v34  ;;  %v1188_v63 = vld [vmem:[#allocation5 + $0x170] sm:$0xff]   ;;  %v1190_v1 = vld [vmem:[#allocation5 + $0x178] sm:$0xff]   ;;  %v1194_v3 = vld [vmem:[#allocation7] sm:$0xff]  }
  0x5a   :  { %1031 = vmatprep.subr.bf16.mxu1 %v1161_v18  ;;  %559 = vmatprep.mubr.bf16.mxu0 %v205_v42  ;;  %v206_v47 = vcombine.high %v204_v43, %v204_v43  ;;  %v1189_v0 = vld [vmem:[#allocation5 + $0x130] sm:$0xff]   ;;  %v1191_v2 = vld [vmem:[#allocation5 + $0x138] sm:$0xff]   ;;  %v1197_v6 = vld [vmem:[#allocation7 + $0x18] sm:$0xff]  }
  0x5b   :  { %1010 = vmatpush3.bf16.msra.mxu0 %v1160_v17  ;;  %v221_v61 = vrot.slane %v207_v58, %v196_v34  ;;  %v222_v62 = vcombine.high %v214_v59, %v214_v59  ;;  %v1195_v4 = vld [vmem:[#allocation7 + $0x8] sm:$0xff]   ;;  %v1196_v5 = vld [vmem:[#allocation7 + $0x10] sm:$0xff]   ;;  %v1198_v7 = vld [vmem:[#allocation7 + $0x20] sm:$0xff]  }
  0x5c   :  { %1011 = vmatprep.subr.bf16.mxu0 %v1163_v20  ;;  %599 = vmatprep.mubr.bf16.mxu1 %v206_v47  ;;  %v1199_v8 = vld [vmem:[#allocation7 + $0x28] sm:$0xff]   ;;  %v1200_v9 = vld [vmem:[#allocation7 + $0x30] sm:$0xff]   ;;  %v1201_v10 = vld [vmem:[#allocation7 + $0x38] sm:$0xff]  }
  0x5d   :  { %1032 = vmatpush3.bf16.msra.mxu1 %v1162_v19  ;;  %v1202_v11 = vld [vmem:[#allocation8] sm:$0xff]   ;;  %v1203_v12 = vld [vmem:[#allocation8 + $0x8] sm:$0xff]   ;;  %v1204_v13 = vld [vmem:[#allocation8 + $0x10] sm:$0xff]  }
  0x5e   :  { %1033 = vmatprep.subr.bf16.mxu1 %v1165_v25  ;;  %v1205_v14 = vld [vmem:[#allocation8 + $0x18] sm:$0xff]   ;;  %v1206_v15 = vld [vmem:[#allocation8 + $0x20] sm:$0xff]   ;;  %v1207_v16 = vld [vmem:[#allocation8 + $0x28] sm:$0xff]  }
  0x5f   :  { %1012 = vmatpush3.bf16.msra.mxu0 %v1164_v24  ;;  %v932_v18 = vld [vmem:[%s1481_s2] ss:$0 sm:$0xff] }
  0x60   :  { %1013 = vmatprep.subr.bf16.mxu0 %v1167_v27 }
  0x61   :  { %1034 = vmatpush3.bf16.msra.mxu1 %v1166_v26 }
  0x62   :  { %1035 = vmatprep.subr.bf16.mxu1 %v1169_v31 }
  0x63   :  { %1014 = vmatpush3.bf16.msra.mxu0 %v1168_v30 }
  0x64   :  { %1015 = vmatprep.subr.bf16.mxu0 %v1171_v33 }
  0x65   :  { %1036 = vmatpush3.bf16.msra.mxu1 %v1170_v32 }
  0x66   :  { %1037 = vmatprep.subr.bf16.mxu1 %v1173_v36 }
  0x67   :  { %1016 = vmatpush3.bf16.msra.mxu0 %v1172_v35 }
  0x68   :  { %1045 = vmatprep.subr.bf16.mxu0 %v1175_v41 }
  0x69   :  { %1038 = vmatpush3.bf16.msra.mxu1 %v1174_v39 }
  0x6a   :  { %1087 = vmatprep.subr.bf16.mxu1 %v1335_v46  ;;  %560 = vmatmul.mubr.bf16.vlgmr.msra.gmra.mrb[0].mxu0 %v197_v38 }
  0x6b   :  { %1046 = vmatpush3.bf16.msra.mxu0 %v1177_v44  ;;  %639 = vmatprep.mubr.bf16.mxu0 %v222_v62  ;;  %v1209_v44 = vld [vmem:[#allocation8 + $0x38] sm:$0xff]  }
  0x6c   :  { %600 = vmatmul.mubr.bf16.vlgmr.msra.gmra.mrb[0].mxu1 %v204_v43  ;;  %1047 = vmatprep.subr.bf16.mxu0 %v1178_v45  ;;  %v1208_v43 = vld [vmem:[#allocation8 + $0x30] sm:$0xff]   ;;  %v983_v45 = vld [vmem:[%s1483_s4] ss:$0 sm:$0xff]  ;;  %s1298_s4 = scalar_lea.vmem %s922_s29, 64 }
  0x6d   :  { %1089 = vmatprep.mubr.msk.bf16.mxu1 %vm1336_vm0, %v1335_v46  ;;  %1088 = vmatpush3.bf16.msra.mxu1 %v1192_v56  ;;  %p1299_p4 = scmp.ne.s32.totalorder %s922_s29, %s1298_s4  ;;  %p1304_p6 = scmp.lt.s32.totalorder %s1298_s4, %s1298_s4 }
  0x6e   :  { %1093 = vmatprep.subr.bf16.mxu1 %v1335_v46 }
  0x6f   :  { %1048 = vmatpush3.bf16.msra.mxu0 %v1179_v48  ;;  %p1305_p7 = por %p1304_p6, %p1303_p5 }
  0x70   :  { %1049 = vmatprep.subr.bf16.mxu0 %v1180_v49 }
  0x71   :  { %p1306_p8 = pnand %p1305_p7, %p1299_p4 }
  0x73   :  { %1050 = vmatpush3.bf16.msra.mxu0 %v1181_v50 }
  0x74   :  { %1051 = vmatprep.subr.bf16.mxu0 %v1182_v51  ;;  %1090 = vmatmul.mubr.msk.bf16.vlgmr.msra.gmra.mrb[4].mxu1 %vm523_vm1, %v221_v61 }
  0x75   :  { %1109 = vmatprep.mubr.msk.bf16.mxu1 %vm1336_vm0, %v1335_v46  ;;  %1094 = vmatpush3.bf16.msra.mxu1 %v1194_v3 }
  0x76   :  { %1095 = vmatprep.subr.bf16.mxu1 %v1335_v46 }
  0x77   :  { %1052 = vmatpush3.bf16.msra.mxu0 %v1183_v52 }
  0x78   :  { %1053 = vmatprep.subr.bf16.mxu0 %v1184_v53 }
  0x79   :  { %1096 = vmatpush3.bf16.msra.mxu1 %v1195_v4 }
  0x7a   :  { %1097 = vmatprep.subr.bf16.mxu1 %v1335_v46 }
  0x7b   :  { %1054 = vmatpush3.bf16.msra.mxu0 %v1185_v54  ;;  %v992_v54 = vld [vmem:[%s1485_s6] ss:$0 sm:$0xff] }
  0x7c   :  { %1055 = vmatprep.subr.bf16.mxu0 %v1186_v55 }
  0x7d   :  { %1098 = vmatpush3.bf16.msra.mxu1 %v1196_v5 }
  0x7e   :  { %1099 = vmatprep.subr.bf16.mxu1 %v1335_v46 }
  0x7f   :  { %1056 = vmatpush3.bf16.msra.mxu0 %v1187_v60 }
  0x80   :  { %1057 = vmatprep.subr.bf16.mxu0 %v1188_v63 }
  0x81   :  { %1100 = vmatpush3.bf16.msra.mxu1 %v1197_v6 }
  0x82   :  { %1101 = vmatprep.subr.bf16.mxu1 %v1335_v46 }
  0x83   :  { %1058 = vmatpush3.bf16.msra.mxu0 %v1189_v0 }
  0x84   :  { %1059 = vmatprep.subr.bf16.mxu0 %v1190_v1 }
  0x85   :  { %1102 = vmatpush3.bf16.msra.mxu1 %v1198_v7 }
  0x86   :  { %1103 = vmatprep.subr.bf16.mxu1 %v1335_v46 }
  0x87   :  { %1060 = vmatpush3.bf16.msra.mxu0 %v1191_v2 }
  0x88   :  { %1113 = vmatprep.subr.bf16.mxu0 %v1335_v46 }
  0x89   :  { %1104 = vmatpush3.bf16.msra.mxu1 %v1199_v8 }
  0x8a   :  { %640 = vmatmul.mubr.bf16.vlgmr.msra.gmra.mrb[4].mxu0 %v214_v59  ;;  %1105 = vmatprep.subr.bf16.mxu1 %v1335_v46 }
  0x8b   :  { %1129 = vmatprep.mubr.msk.bf16.mxu0 %vm1336_vm0, %v1335_v46  ;;  %1114 = vmatpush3.bf16.msra.mxu0 %v1202_v11 }
  0x8c   :  { %1115 = vmatprep.subr.bf16.mxu0 %v1335_v46 }
  0x8d   :  { %1106 = vmatpush3.bf16.msra.mxu1 %v1200_v9 }
  0x8e   :  { %1107 = vmatprep.subr.bf16.mxu1 %v1335_v46 }
  0x8f   :  { %1116 = vmatpush3.bf16.msra.mxu0 %v1203_v12 }
  0x90   :  { %1117 = vmatprep.subr.bf16.mxu0 %v1335_v46 }
  0x91   :  { %1108 = vmatpush3.bf16.msra.mxu1 %v1201_v10 }
  0x93   :  { %1118 = vmatpush3.bf16.msra.mxu0 %v1204_v13 }
  0x94   :  { %1119 = vmatprep.subr.bf16.mxu0 %v1335_v46 }
  0x97   :  { %1120 = vmatpush3.bf16.msra.mxu0 %v1205_v14 }
  0x98   :  { %1121 = vmatprep.subr.bf16.mxu0 %v1335_v46 }
  0x9b   :  { %1122 = vmatpush3.bf16.msra.mxu0 %v1206_v15 }
  0x9c   :  { %1123 = vmatprep.subr.bf16.mxu0 %v1335_v46 }
  0x9f   :  { %1124 = vmatpush3.bf16.msra.mxu0 %v1207_v16 }
  0xa0   :  { %1125 = vmatprep.subr.bf16.mxu0 %v1335_v46 }
  0xa3   :  { %1126 = vmatpush3.bf16.msra.mxu0 %v1208_v43 }
  0xa4   :  { %1127 = vmatprep.subr.bf16.mxu0 %v1335_v46 }
  0xa7   :  { %1128 = vmatpush3.bf16.msra.mxu0 %v1209_v44 }
 0x13d   :  { %v1017_v17 = vpop.f32.mrb[0].mxu0 }
 0x13e   :  { %v1018_v19 = vpop.f32.mrb[1].mxu0 }
 0x13f   :  { %v1019_v20 = vadd.f32 %v1018_v19, %v1017_v17  ;;  %v1020_v21 = vpop.f32.mrb[2].mxu0  ;;  %v1039_v22 = vpop.f32.mrb[0].mxu1 }
 0x140   :  { %v1021_v23 = vpop.f32.mrb[3].mxu0  ;;  %v1040_v24 = vpop.f32.mrb[1].mxu1 }
 0x141   :  { %v562_v25 = vadd.f32 %v1019_v20, %v932_v18  ;;  %v1041_v26 = vadd.f32 %v1040_v24, %v1039_v22  ;;  %v1042_v27 = vpop.f32.mrb[2].mxu1 }
 0x142   :  { %v1043_v28 = vpop.f32.mrb[3].mxu1 }
 0x143   :  { %v602_v29 = vadd.f32 %v1041_v26, %v562_v25 }
 0x147   :  { %v681_v30 = vpop.f32.mrb[4].mxu1 }
 0x148   :  { %v1091_v31 = vpop.f32.mrb[5].mxu1 }
 0x149   :  { %v684_v32 = vpop.f32.mrb[6].mxu1 }
 0x14a   :  { %v1092_v33 = vpop.f32.mrb[7].mxu1 }
 0x15d   :  { %v1061_v34 = vpop.f32.mrb[4].mxu0 }
 0x15e   :  { %v1062_v35 = vpop.f32.mrb[5].mxu0 }
 0x15f   :  { %v1063_v36 = vadd.f32 %v1062_v35, %v1061_v34  ;;  %v1064_v37 = vpop.f32.mrb[6].mxu0 }
 0x160   :  { %v1065_v38 = vpop.f32.mrb[7].mxu0 }
 0x161   :  { %v642_v39 = vadd.f32 %v1063_v36, %v602_v29 }
 0x163   :  { %v682_v40 = vadd.f32 %v681_v30, %v642_v39 }
 0x165   :  { %v687_v41 = vmax.f32 %v682_v40, 0.0 }
 0x167   :  { %v688_v42 = vpack.c.bf16 %v687_v41, %v687_v41 }
 0x169   :  { %1110 = vmatmul.mubr.bf16.vlgmr.msra.gmra.mrb[8].mxu1 %v688_v42 }
 0x23c   :  { %v794_v47 = vpop.f32.mrb[8].mxu1 }
 0x23d   :  { %v795_v48 = vadd.f32 %v983_v45, %v794_v47  ;;  %v1111_v49 = vpop.f32.mrb[9].mxu1 }
 0x23e   :  { %v797_v50 = vpop.f32.mrb[10].mxu1 }
 0x23f   :  { %v800_v51 = vmax.f32 %v795_v48, 0.0  ;;  %v1112_v52 = vpop.f32.mrb[11].mxu1 }
 0x241   :  { %v801_v53 = vpack.c.bf16 %v800_v51, %v800_v51 }
 0x243   :  { %1130 = vmatmul.mubr.bf16.vlgmr.msra.gmra.mrb[8].mxu0 %v801_v53 }
 0x316   :  { %v907_v46 = vpop.f32.mrb[8].mxu0 }
 0x317   :  { %v908_v55 = vadd.f32 %v992_v54, %v907_v46  ;;  %v1131_v56 = vpop.f32.mrb[9].mxu0 }
 0x318   :  { %v910_v57 = vpop.f32.mrb[10].mxu0 }
 0x319   :  { %v1132_v58 = vpop.f32.mrb[11].mxu0  ;;  %914 = vst.msk [vmem:[#allocation10] sm:$0xf] %vm913_vm2, %v908_v55 }
 0x31a   :  { %1309 = shalt.err (!%p1306_p8)
}
 0x31b   :  { %s1310_s6 = scalar_lea.hbm %s1486_s7, 64 }
 0x31c   :  { %p1311_p9 = scmp.ne.s32.totalorder %s1486_s7, %s1310_s6  ;;  %p1314_p10 = scmp.lt.u32.totalorder %s1310_s6, %s1486_s7 }
 0x31e   :  { %p1316_p11 = pnand %p1314_p10, %p1311_p9 }
 0x320   :  { %1319 = shalt.err (!%p1316_p11)
}
 0x321   :  { %924 = dma.vmem_to_hbm [thread:$0]  %s922_s29, 64, %s1486_s7, [#allocation4]  }
 0x322   :  { %1326 = dma.done.wait [#allocation4], 64  }
 0x323   :  { %1327 = vsyncadd [#allocation4], 4294967232 }
 0x324   :  { %928 = vsyncpa [#allocation3], 1 }
 0x325   :  { %929 = vsyncpa [#allocation6], 1 }
 0x326   :  { %930 = vsyncpa [#allocation9], 1 }
 0x327   :  { %931 = vsyncpa [#allocation4], 1 }

</bundles_post_ra>
